<compile_context>
chip_gen: v7x
topology: tpu7x:2x2x1
jax: 0.10.0
libtpu: 0.0.40
codegen_flags: <defaults>
</compile_context>

<pallas_src>
import jax
import jax.numpy as jnp
from jax import lax
from jax.experimental import pallas as pl
from jax.experimental.pallas import tpu as pltpu


def _round_up(x, m):
    return ((x + m - 1) // m) * m


def _make_amnre_kernel(n_valid, tm, compute_dtype):
    """Build the row-tiled AMNRE loss kernel (partial sum per grid step)."""

    def kernel(th_ref, thp_ref, x_ref, b_ref,
               wth_ref, wx_ref, wb_ref, b1_ref,
               w2_ref, b2_ref, w3t_ref, b3_ref,
               out_ref):
        f32 = jnp.float32
        cdt = compute_dtype

        bm = b_ref[...]                       # (TM, D)  0/1 mask in compute dtype
        s = 2.0 * bm - 1.0                    # 2b - 1
        th = th_ref[...] * bm                 # theta  * b
        thp = thp_ref[...] * bm               # theta' * b

        # Layer-1 columns for x and the mask are identical for both halves of the
        # batch: compute once per row tile and reuse.
        shared = (jnp.dot(x_ref[...], wx_ref[...], preferred_element_type=f32)
                  + jnp.dot(s, wb_ref[...], preferred_element_type=f32)
                  + b1_ref[...])              # (TM, Hp) f32

        b3 = b3_ref[0, 0]

        def log_ratio(t):
            h1 = jnp.maximum(
                shared + jnp.dot(t, wth_ref[...], preferred_element_type=f32), 0.0)
            h2 = jnp.maximum(
                jnp.dot(h1.astype(cdt), w2_ref[...], preferred_element_type=f32)
                + b2_ref[...], 0.0)
            # Hp -> 1 head as a VPU multiply + lane reduce (no 1-wide MXU matmul).
            return jnp.sum(h2 * w3t_ref[...], axis=-1, keepdims=True) + b3  # (TM,1)

        z1 = log_ratio(th)      # log r(theta  | x, b)   -> -logsigmoid(z1)
        z0 = log_ratio(thp)     # log r(theta' | x, b)   -> -logsigmoid(-z0)

        def softplus(y):        # numerically stable softplus(y) == -logsigmoid(-y)
            return jnp.maximum(y, 0.0) + jnp.log1p(jnp.exp(-jnp.abs(y)))

        per = softplus(-z1) + softplus(z0)    # (TM, 1) per-row contribution

        # Mask rows that only exist because the batch was padded up to TM.
        row = pl.program_id(0) * tm + lax.broadcasted_iota(jnp.int32, (tm, 1), 0)
        per = jnp.where(row < n_valid, per, 0.0)

        out_ref[0, 0] = jnp.sum(per)          # per-tile partial sum (f32)

    return kernel


def init_params(key, fin, hidden):
    k1, k2, k3 = jax.random.split(key, 3)
    w1 = jax.random.normal(k1, (fin, hidden), jnp.float32) / jnp.sqrt(fin)
    b1 = jnp.zeros((1, hidden), jnp.float32)
    w2 = jax.random.normal(k2, (hidden, hidden), jnp.float32) / jnp.sqrt(hidden)
    b2 = jnp.zeros((1, hidden), jnp.float32)
    w3 = jax.random.normal(k3, (hidden, 1), jnp.float32) / jnp.sqrt(hidden)
    b3 = jnp.zeros((1, 1), jnp.float32)
    return (w1, b1, w2, b2, w3, b3)


def amnre_loss(theta, x, b, params, *, compute_dtype=jnp.float32, tile_rows=None):
    n, d = theta.shape
    l = x.shape[-1]
    w1, b1, w2, b2, w3, b3 = params
    fin, h = w1.shape
    assert fin == 2 * d + l, "w1 rows must be [theta | x | mask] = 2D + L"

    # --- pad hidden dim to the 128-lane width (zero pads are exact no-ops) ------
    hp = _round_up(h, 128)
    w1p = jnp.pad(w1, ((0, 0), (0, hp - h)))
    b1p = jnp.pad(b1, ((0, 0), (0, hp - h)))
    w2p = jnp.pad(w2, ((0, hp - h), (0, hp - h)))
    b2p = jnp.pad(b2, ((0, 0), (0, hp - h)))
    w3t = jnp.pad(w3, ((0, hp - h), (0, 0))).reshape(1, hp)   # head as a lane row

    # --- split layer-1 weight by feature group: [theta*b | x | 2b-1] ------------
    w_th, w_x, w_b = w1p[:d], w1p[d:d + l], w1p[d + l:]

    theta_prime = jnp.roll(theta, 1, axis=0)   # tiny (N, D) op, stays in JAX
    bm = b.astype(jnp.float32)

    # --- row tiling: large tiles amortize per-step overhead ---------------------
    if tile_rows is None:
        tile_rows = 512
    tm = min(_round_up(tile_rows, 8), _round_up(n, 8))
    n_pad = _round_up(n, tm)
    num_tiles = n_pad // tm

    cdt = compute_dtype
    pad_b = lambda a: jnp.pad(a, ((0, n_pad - n), (0, 0))).astype(cdt)
    th_in, thp_in, x_in, b_in = pad_b(theta), pad_b(theta_prime), pad_b(x), pad_b(bm)

    args = (th_in, thp_in, x_in, b_in,
            w_th.astype(cdt), w_x.astype(cdt), w_b.astype(cdt),
            b1p.astype(jnp.float32),
            w2p.astype(cdt), b2p.astype(jnp.float32),
            w3t.astype(jnp.float32), b3.astype(jnp.float32))

    row = lambda last: pl.BlockSpec((tm, last), lambda i: (i, 0))
    full = lambda shape: pl.BlockSpec(shape, lambda i: (0, 0))
    in_specs = [
        row(d), row(d), row(l), row(d),                   # theta, theta', x, b
        full((d, hp)), full((l, hp)), full((d, hp)),      # W_theta, W_x, W_b
        full((1, hp)), full((hp, hp)), full((1, hp)),     # b1, W2, b2
        full((1, hp)),                                    # w3 (as a lane row)
        pl.BlockSpec((1, 1), lambda i: (0, 0),
                     memory_space=pltpu.MemorySpace.SMEM),  # b3 scalar
    ]

    itemsize = jnp.dtype(cdt).itemsize
    flops = int(n_pad * (2 * l * hp + 2 * d * hp
                         + 2 * (2 * d * hp + 2 * hp * hp + 2 * hp)))
    bytes_accessed = int(n_pad * (3 * d + l) * itemsize             # batch rows
                         + ((2 * d + l) * hp + hp * hp) * itemsize  # weights
                         + 3 * hp * 4 + 4 + num_tiles * 4)          # biases + out
    cost = pl.CostEstimate(flops=flops, transcendentals=int(4 * n_pad),
                           bytes_accessed=bytes_accessed)

    partial_sums = pl.pallas_call(
        _make_amnre_kernel(n, tm, cdt),
        out_shape=jax.ShapeDtypeStruct((num_tiles, 1), jnp.float32),
        grid=(num_tiles,),
        in_specs=in_specs,
        out_specs=pl.BlockSpec((1, 1), lambda i: (i, 0),
                               memory_space=pltpu.MemorySpace.SMEM),
        compiler_params=pltpu.CompilerParams(
            # Independent per-tile partial sums -> both TensorCores on v7x.
            dimension_semantics=("parallel",),
            vmem_limit_bytes=32 * 1024 * 1024),
        cost_estimate=cost,
    )(*args)

    # (l1 + l0) / 2 with each l a mean over N elements == total sum / (2N)
    return jnp.sum(partial_sums) / (2.0 * n)


def amnre_loss_ref(theta, x, b, params):
    """Pure-JAX reference mirroring the PyTorch module semantics."""
    w1, b1, w2, b2, w3, b3 = params
    theta_prime = jnp.roll(theta, 1, axis=0)
    bm = b.astype(theta.dtype)
    f1 = jnp.concatenate([theta * bm, x, 2.0 * bm - 1.0], axis=-1)
    f0 = jnp.concatenate([theta_prime * bm, x, 2.0 * bm - 1.0], axis=-1)
    feats = jnp.concatenate([f1, f0], axis=0)
    h1 = jax.nn.relu(feats @ w1 + b1)
    h2 = jax.nn.relu(h1 @ w2 + b2)
    z = (h2 @ w3 + b3)[:, 0]
    n = theta.shape[0]
    log_r, log_r_prime = z[:n], z[n:]
    l1 = -jnp.mean(jax.nn.log_sigmoid(log_r))
    l0 = -jnp.mean(jax.nn.log_sigmoid(-log_r_prime))
    return (l1 + l0) / 2.0


if __name__ == "__main__":
    key = jax.random.PRNGKey(0)
    k_theta, k_x, k_b, k_p = jax.random.split(key, 4)

    N, D, L, H = 8, 4, 16, 32          # theta: (N, D), x: (N, L), hidden H
    theta = jax.random.normal(k_theta, (N, D), jnp.float32)
    x = jax.random.normal(k_x, (N, L), jnp.float32)
    # mask_dist.sample(theta.shape[:-1]) -> Bernoulli(0.5) masks of shape (N, D)
    b = jax.random.bernoulli(k_b, 0.5, (N, D))
    params = init_params(k_p, 2 * D + L, H)

    # f32 path, single tile
    loss = amnre_loss(theta, x, b, params)
    jax.block_until_ready(loss)
    ref = amnre_loss_ref(theta, x, b, params)
    assert jnp.allclose(loss, ref, atol=1e-4, rtol=1e-4), (loss, ref)

    # multi-tile + batch-padding path (N not a multiple of the row tile)
    N2 = 20
    k2t, k2x, k2b = jax.random.split(jax.random.PRNGKey(1), 3)
    theta2 = jax.random.normal(k2t, (N2, D), jnp.float32)
    x2 = jax.random.normal(k2x, (N2, L), jnp.float32)
    b2m = jax.random.bernoulli(k2b, 0.5, (N2, D))
    loss2 = amnre_loss(theta2, x2, b2m, params, tile_rows=8)
    jax.block_until_ready(loss2)
    ref2 = amnre_loss_ref(theta2, x2, b2m, params)
    assert jnp.allclose(loss2, ref2, atol=1e-4, rtol=1e-4), (loss2, ref2)

    # bf16 MXU operands (f32 accumulation / epilogue); loose tolerance vs f32 ref
    loss_bf16 = amnre_loss(theta, x, b, params, compute_dtype=jnp.bfloat16)
    jax.block_until_ready(loss_bf16)
    assert jnp.allclose(loss_bf16, ref, atol=1e-1, rtol=1e-1), (loss_bf16, ref)

    print("KERNEL_OK")
</pallas_src>

<mosaic_0001>
module attributes {stable_mosaic.version = 11 : i64} {
  func.func @kernel(%arg0: i32, %arg1: memref<8x4xf32, #tpu.memory_space<vmem>>, %arg2: memref<8x4xf32, #tpu.memory_space<vmem>>, %arg3: memref<8x16xf32, #tpu.memory_space<vmem>>, %arg4: memref<8x4xf32, #tpu.memory_space<vmem>>, %arg5: memref<4x128xf32, #tpu.memory_space<vmem>>, %arg6: memref<16x128xf32, #tpu.memory_space<vmem>>, %arg7: memref<4x128xf32, #tpu.memory_space<vmem>>, %arg8: memref<1x128xf32, #tpu.memory_space<vmem>>, %arg9: memref<128x128xf32, #tpu.memory_space<vmem>>, %arg10: memref<1x128xf32, #tpu.memory_space<vmem>>, %arg11: memref<1x128xf32, #tpu.memory_space<vmem>>, %arg12: memref<1x1xf32, #tpu.memory_space<smem>>, %arg13: memref<1x1xf32, #tpu.memory_space<smem>>) attributes {dimension_semantics = [#tpu.dimension_semantics<parallel>], iteration_bounds = array<i64: 1>, scalar_prefetch = 0 : i64, scratch_operands = 0 : i64, tpu.core_type = #tpu.core_type<tc>, window_params = [{transform_indices = @transform_0, window_bounds = array<i64: 8, 4>}, {transform_indices = @transform_1, window_bounds = array<i64: 8, 4>}, {transform_indices = @transform_2, window_bounds = array<i64: 8, 16>}, {transform_indices = @transform_3, window_bounds = array<i64: 8, 4>}, {pipeline_mode = #tpu.pipeline_mode<synchronous>, transform_indices = @transform_4, window_bounds = array<i64: 4, 128>}, {pipeline_mode = #tpu.pipeline_mode<synchronous>, transform_indices = @transform_5, window_bounds = array<i64: 16, 128>}, {pipeline_mode = #tpu.pipeline_mode<synchronous>, transform_indices = @transform_6, window_bounds = array<i64: 4, 128>}, {pipeline_mode = #tpu.pipeline_mode<synchronous>, transform_indices = @transform_7, window_bounds = array<i64: 1, 128>}, {pipeline_mode = #tpu.pipeline_mode<synchronous>, transform_indices = @transform_8, window_bounds = array<i64: 128, 128>}, {pipeline_mode = #tpu.pipeline_mode<synchronous>, transform_indices = @transform_9, window_bounds = array<i64: 1, 128>}, {pipeline_mode = #tpu.pipeline_mode<synchronous>, transform_indices = @transform_10, window_bounds = array<i64: 1, 128>}, {transform_indices = @transform_11, window_bounds = array<i64: 1, 1>}, {transform_indices = @transform_12, window_bounds = array<i64: 1, 1>}]} {
    %c0 = arith.constant 0 : index
    %c0_0 = arith.constant 0 : index
    %0 = vector.load %arg4[%c0, %c0_0] : memref<8x4xf32, #tpu.memory_space<vmem>>, vector<8x4xf32>
    %cst = arith.constant 2.000000e+00 : f32
    %1 = vector.broadcast %cst : f32 to vector<8x4xf32>
    %2 = arith.mulf %1, %0 : vector<8x4xf32>
    %cst_1 = arith.constant 1.000000e+00 : f32
    %3 = vector.broadcast %cst_1 : f32 to vector<8x4xf32>
    %4 = arith.subf %2, %3 : vector<8x4xf32>
    %c0_2 = arith.constant 0 : index
    %c0_3 = arith.constant 0 : index
    %5 = vector.load %arg1[%c0_2, %c0_3] : memref<8x4xf32, #tpu.memory_space<vmem>>, vector<8x4xf32>
    %6 = arith.mulf %5, %0 : vector<8x4xf32>
    %c0_4 = arith.constant 0 : index
    %c0_5 = arith.constant 0 : index
    %7 = vector.load %arg2[%c0_4, %c0_5] : memref<8x4xf32, #tpu.memory_space<vmem>>, vector<8x4xf32>
    %8 = arith.mulf %7, %0 : vector<8x4xf32>
    %c0_6 = arith.constant 0 : index
    %c0_7 = arith.constant 0 : index
    %9 = vector.load %arg3[%c0_6, %c0_7] : memref<8x16xf32, #tpu.memory_space<vmem>>, vector<8x16xf32>
    %c0_8 = arith.constant 0 : index
    %c0_9 = arith.constant 0 : index
    %10 = vector.load %arg6[%c0_8, %c0_9] : memref<16x128xf32, #tpu.memory_space<vmem>>, vector<16x128xf32>
    %cst_10 = arith.constant dense<0.000000e+00> : vector<8x128xf32>
    %11 = tpu.matmul %9, %10, %cst_10 {dimension_numbers = #tpu.dot_dimension_numbers<[1], [0], [0], [1], [0, 0, 1, 1], [], []>} : vector<8x16xf32>, vector<16x128xf32>, vector<8x128xf32> -> vector<8x128xf32>
    %c0_11 = arith.constant 0 : index
    %c0_12 = arith.constant 0 : index
    %12 = vector.load %arg7[%c0_11, %c0_12] : memref<4x128xf32, #tpu.memory_space<vmem>>, vector<4x128xf32>
    %cst_13 = arith.constant dense<0.000000e+00> : vector<8x128xf32>
    %13 = tpu.matmul %4, %12, %cst_13 {dimension_numbers = #tpu.dot_dimension_numbers<[1], [0], [0], [1], [0, 0, 1, 1], [], []>} : vector<8x4xf32>, vector<4x128xf32>, vector<8x128xf32> -> vector<8x128xf32>
    %14 = arith.addf %11, %13 : vector<8x128xf32>
    %c0_14 = arith.constant 0 : index
    %c0_15 = arith.constant 0 : index
    %15 = vector.load %arg8[%c0_14, %c0_15] : memref<1x128xf32, #tpu.memory_space<vmem>>, vector<1x128xf32>
    %16 = vector.broadcast %15 : vector<1x128xf32> to vector<8x128xf32>
    %17 = arith.addf %14, %16 : vector<8x128xf32>
    %c0_16 = arith.constant 0 : index
    %c0_17 = arith.constant 0 : index
    %18 = memref.load %arg12[%c0_16, %c0_17] : memref<1x1xf32, #tpu.memory_space<smem>>
    %c0_18 = arith.constant 0 : index
    %c0_19 = arith.constant 0 : index
    %19 = vector.load %arg5[%c0_18, %c0_19] : memref<4x128xf32, #tpu.memory_space<vmem>>, vector<4x128xf32>
    %cst_20 = arith.constant dense<0.000000e+00> : vector<8x128xf32>
    %20 = tpu.matmul %6, %19, %cst_20 {dimension_numbers = #tpu.dot_dimension_numbers<[1], [0], [0], [1], [0, 0, 1, 1], [], []>} : vector<8x4xf32>, vector<4x128xf32>, vector<8x128xf32> -> vector<8x128xf32>
    %21 = arith.addf %17, %20 : vector<8x128xf32>
    %cst_21 = arith.constant 0.000000e+00 : f32
    %22 = vector.broadcast %cst_21 : f32 to vector<8x128xf32>
    %23 = arith.maximumf %21, %22 : vector<8x128xf32>
    %c0_22 = arith.constant 0 : index
    %c0_23 = arith.constant 0 : index
    %24 = vector.load %arg9[%c0_22, %c0_23] : memref<128x128xf32, #tpu.memory_space<vmem>>, vector<128x128xf32>
    %cst_24 = arith.constant dense<0.000000e+00> : vector<8x128xf32>
    %25 = tpu.matmul %23, %24, %cst_24 {dimension_numbers = #tpu.dot_dimension_numbers<[1], [0], [0], [1], [0, 0, 1, 1], [], []>} : vector<8x128xf32>, vector<128x128xf32>, vector<8x128xf32> -> vector<8x128xf32>
    %c0_25 = arith.constant 0 : index
    %c0_26 = arith.constant 0 : index
    %26 = vector.load %arg10[%c0_25, %c0_26] : memref<1x128xf32, #tpu.memory_space<vmem>>, vector<1x128xf32>
    %27 = vector.broadcast %26 : vector<1x128xf32> to vector<8x128xf32>
    %28 = arith.addf %25, %27 : vector<8x128xf32>
    %cst_27 = arith.constant 0.000000e+00 : f32
    %29 = vector.broadcast %cst_27 : f32 to vector<8x128xf32>
    %30 = arith.maximumf %28, %29 : vector<8x128xf32>
    %c0_28 = arith.constant 0 : index
    %c0_29 = arith.constant 0 : index
    %31 = vector.load %arg11[%c0_28, %c0_29] : memref<1x128xf32, #tpu.memory_space<vmem>>, vector<1x128xf32>
    %32 = vector.broadcast %31 : vector<1x128xf32> to vector<8x128xf32>
    %33 = arith.mulf %30, %32 : vector<8x128xf32>
    %cst_30 = arith.constant dense<0.000000e+00> : vector<8xf32>
    %34 = vector.multi_reduction <add>, %33, %cst_30 [1] : vector<8x128xf32> to vector<8xf32>
    %35 = vector.shape_cast %34 : vector<8xf32> to vector<8x1xf32>
    %36 = vector.broadcast %18 : f32 to vector<8x1xf32>
    %37 = arith.addf %35, %36 : vector<8x1xf32>
    %c0_31 = arith.constant 0 : index
    %c0_32 = arith.constant 0 : index
    %38 = vector.load %arg5[%c0_31, %c0_32] : memref<4x128xf32, #tpu.memory_space<vmem>>, vector<4x128xf32>
    %cst_33 = arith.constant dense<0.000000e+00> : vector<8x128xf32>
    %39 = tpu.matmul %8, %38, %cst_33 {dimension_numbers = #tpu.dot_dimension_numbers<[1], [0], [0], [1], [0, 0, 1, 1], [], []>} : vector<8x4xf32>, vector<4x128xf32>, vector<8x128xf32> -> vector<8x128xf32>
    %40 = arith.addf %17, %39 : vector<8x128xf32>
    %cst_34 = arith.constant 0.000000e+00 : f32
    %41 = vector.broadcast %cst_34 : f32 to vector<8x128xf32>
    %42 = arith.maximumf %40, %41 : vector<8x128xf32>
    %c0_35 = arith.constant 0 : index
    %c0_36 = arith.constant 0 : index
    %43 = vector.load %arg9[%c0_35, %c0_36] : memref<128x128xf32, #tpu.memory_space<vmem>>, vector<128x128xf32>
    %cst_37 = arith.constant dense<0.000000e+00> : vector<8x128xf32>
    %44 = tpu.matmul %42, %43, %cst_37 {dimension_numbers = #tpu.dot_dimension_numbers<[1], [0], [0], [1], [0, 0, 1, 1], [], []>} : vector<8x128xf32>, vector<128x128xf32>, vector<8x128xf32> -> vector<8x128xf32>
    %c0_38 = arith.constant 0 : index
    %c0_39 = arith.constant 0 : index
    %45 = vector.load %arg10[%c0_38, %c0_39] : memref<1x128xf32, #tpu.memory_space<vmem>>, vector<1x128xf32>
    %46 = vector.broadcast %45 : vector<1x128xf32> to vector<8x128xf32>
    %47 = arith.addf %44, %46 : vector<8x128xf32>
    %cst_40 = arith.constant 0.000000e+00 : f32
    %48 = vector.broadcast %cst_40 : f32 to vector<8x128xf32>
    %49 = arith.maximumf %47, %48 : vector<8x128xf32>
    %c0_41 = arith.constant 0 : index
    %c0_42 = arith.constant 0 : index
    %50 = vector.load %arg11[%c0_41, %c0_42] : memref<1x128xf32, #tpu.memory_space<vmem>>, vector<1x128xf32>
    %51 = vector.broadcast %50 : vector<1x128xf32> to vector<8x128xf32>
    %52 = arith.mulf %49, %51 : vector<8x128xf32>
    %cst_43 = arith.constant dense<0.000000e+00> : vector<8xf32>
    %53 = vector.multi_reduction <add>, %52, %cst_43 [1] : vector<8x128xf32> to vector<8xf32>
    %54 = vector.shape_cast %53 : vector<8xf32> to vector<8x1xf32>
    %55 = vector.broadcast %18 : f32 to vector<8x1xf32>
    %56 = arith.addf %54, %55 : vector<8x1xf32>
    %cst_44 = arith.constant 0.000000e+00 : f32
    %57 = vector.broadcast %cst_44 : f32 to vector<8x1xf32>
    %58 = arith.subf %57, %37 : vector<8x1xf32>
    %cst_45 = arith.constant 0.000000e+00 : f32
    %59 = vector.broadcast %cst_45 : f32 to vector<8x1xf32>
    %60 = arith.maximumf %58, %59 : vector<8x1xf32>
    %61 = math.absf %58 : vector<8x1xf32>
    %cst_46 = arith.constant 0.000000e+00 : f32
    %62 = vector.broadcast %cst_46 : f32 to vector<8x1xf32>
    %63 = arith.subf %62, %61 : vector<8x1xf32>
    %64 = math.exp %63 : vector<8x1xf32>
    %65 = math.log1p %64 : vector<8x1xf32>
    %66 = arith.addf %60, %65 : vector<8x1xf32>
    %cst_47 = arith.constant 0.000000e+00 : f32
    %67 = vector.broadcast %cst_47 : f32 to vector<8x1xf32>
    %68 = arith.maximumf %56, %67 : vector<8x1xf32>
    %69 = math.absf %56 : vector<8x1xf32>
    %cst_48 = arith.constant 0.000000e+00 : f32
    %70 = vector.broadcast %cst_48 : f32 to vector<8x1xf32>
    %71 = arith.subf %70, %69 : vector<8x1xf32>
    %72 = math.exp %71 : vector<8x1xf32>
    %73 = math.log1p %72 : vector<8x1xf32>
    %74 = arith.addf %68, %73 : vector<8x1xf32>
    %75 = arith.addf %66, %74 : vector<8x1xf32>
    %c8_i32 = arith.constant 8 : i32
    %76 = arith.muli %arg0, %c8_i32 : i32
    %77 = tpu.iota {dimensions = array<i32: 0>} : vector<8x1xi32>
    %78 = vector.broadcast %76 : i32 to vector<8x1xi32>
    %79 = arith.addi %78, %77 : vector<8x1xi32>
    %c8_i32_49 = arith.constant 8 : i32
    %80 = vector.broadcast %c8_i32_49 : i32 to vector<8x1xi32>
    %81 = arith.cmpi slt, %79, %80 : vector<8x1xi32>
    %cst_50 = arith.constant 0.000000e+00 : f32
    %82 = vector.broadcast %cst_50 : f32 to vector<8x1xf32>
    %83 = arith.select %81, %75, %82 : vector<8x1xi1>, vector<8x1xf32>
    %84 = vector.shape_cast %83 : vector<8x1xf32> to vector<1x8x1xf32>
    %cst_51 = arith.constant dense<0.000000e+00> : vector<1xf32>
    %85 = vector.multi_reduction <add>, %84, %cst_51 [1, 2] : vector<1x8x1xf32> to vector<1xf32>
    %86 = vector.shape_cast %85 : vector<1xf32> to vector<1x1x1xf32>
    %87 = vector.extract %86[0, 0, 0] : f32 from vector<1x1x1xf32>
    %c0_52 = arith.constant 0 : index
    %c0_53 = arith.constant 0 : index
    %88 = memref.load %arg13[%c0_52, %c0_53] : memref<1x1xf32, #tpu.memory_space<smem>>
    memref.store %87, %arg13[%c0_52, %c0_53] : memref<1x1xf32, #tpu.memory_space<smem>>
    return
  }
  func.func @transform_0(%arg0: i32) -> (i32, i32) {
    %c0_i32 = arith.constant 0 : i32
    %c0_i32_0 = arith.constant 0 : i32
    return %arg0, %c0_i32 : i32, i32
  }
  func.func @transform_1(%arg0: i32) -> (i32, i32) {
    %c0_i32 = arith.constant 0 : i32
    %c0_i32_0 = arith.constant 0 : i32
    return %arg0, %c0_i32 : i32, i32
  }
  func.func @transform_2(%arg0: i32) -> (i32, i32) {
    %c0_i32 = arith.constant 0 : i32
    %c0_i32_0 = arith.constant 0 : i32
    return %arg0, %c0_i32 : i32, i32
  }
  func.func @transform_3(%arg0: i32) -> (i32, i32) {
    %c0_i32 = arith.constant 0 : i32
    %c0_i32_0 = arith.constant 0 : i32
    return %arg0, %c0_i32 : i32, i32
  }
  func.func @transform_4(%arg0: i32) -> (i32, i32) {
    %c0_i32 = arith.constant 0 : i32
    %c0_i32_0 = arith.constant 0 : i32
    %c0_i32_1 = arith.constant 0 : i32
    return %c0_i32, %c0_i32_0 : i32, i32
  }
  func.func @transform_5(%arg0: i32) -> (i32, i32) {
    %c0_i32 = arith.constant 0 : i32
    %c0_i32_0 = arith.constant 0 : i32
    %c0_i32_1 = arith.constant 0 : i32
    return %c0_i32, %c0_i32_0 : i32, i32
  }
  func.func @transform_6(%arg0: i32) -> (i32, i32) {
    %c0_i32 = arith.constant 0 : i32
    %c0_i32_0 = arith.constant 0 : i32
    %c0_i32_1 = arith.constant 0 : i32
    return %c0_i32, %c0_i32_0 : i32, i32
  }
  func.func @transform_7(%arg0: i32) -> (i32, i32) {
    %c0_i32 = arith.constant 0 : i32
    %c0_i32_0 = arith.constant 0 : i32
    %c0_i32_1 = arith.constant 0 : i32
    return %c0_i32, %c0_i32_0 : i32, i32
  }
  func.func @transform_8(%arg0: i32) -> (i32, i32) {
    %c0_i32 = arith.constant 0 : i32
    %c0_i32_0 = arith.constant 0 : i32
    %c0_i32_1 = arith.constant 0 : i32
    return %c0_i32, %c0_i32_0 : i32, i32
  }
  func.func @transform_9(%arg0: i32) -> (i32, i32) {
    %c0_i32 = arith.constant 0 : i32
    %c0_i32_0 = arith.constant 0 : i32
    %c0_i32_1 = arith.constant 0 : i32
    return %c0_i32, %c0_i32_0 : i32, i32
  }
  func.func @transform_10(%arg0: i32) -> (i32, i32) {
    %c0_i32 = arith.constant 0 : i32
    %c0_i32_0 = arith.constant 0 : i32
    %c0_i32_1 = arith.constant 0 : i32
    return %c0_i32, %c0_i32_0 : i32, i32
  }
  func.func @transform_11(%arg0: i32) -> (i32, i32) {
    %c0_i32 = arith.constant 0 : i32
    %c0_i32_0 = arith.constant 0 : i32
    %c0_i32_1 = arith.constant 0 : i32
    return %c0_i32, %c0_i32_0 : i32, i32
  }
  func.func @transform_12(%arg0: i32) -> (i32, i32) {
    %c0_i32 = arith.constant 0 : i32
    %c0_i32_0 = arith.constant 0 : i32
    return %arg0, %c0_i32 : i32, i32
  }
}

</mosaic_0001>

<bundles_post_ra>
// kernel: tpu_custom_call.1
= control target key start
LH: loop header
LB: loop body
LE: loop exit
PB: predicated region body
PF: predicated region fallthrough
CT: control target
= control target key end

     0   :  { %18 = vsyncpa [#allocation4], 0  ;;  %s1041_s0 = inlined_call_operand.vmem [shape: f32[8,4], index: 0, kind: input, shape index: {}]   ;;  %s1042_s1 = inlined_call_operand.vmem [shape: f32[8,4], index: 1, kind: input, shape index: {}]   ;;  %s1043_s2 = inlined_call_operand.vmem [shape: f32[8,16], index: 2, kind: input, shape index: {}]   ;;  %s1044_s3 = inlined_call_operand.vmem [shape: f32[8,4], index: 3, kind: input, shape index: {}]   ;;  %s1045_s4 = inlined_call_operand.vmem [shape: f32[4,128], index: 4, kind: input, shape index: {}]   ;;  %s1046_s5 = inlined_call_operand.vmem [shape: f32[16,128], index: 5, kind: input, shape index: {}]   ;;  %s1047_s6 = inlined_call_operand.vmem [shape: f32[4,128], index: 6, kind: input, shape index: {}]   ;;  %s1048_s7 = inlined_call_operand.vmem [shape: f32[1,128], index: 7, kind: input, shape index: {}]   ;;  %s1049_s8 = inlined_call_operand.hbm [shape: f32[128,128], index: 8, kind: input, shape index: {}]   ;;  %s1050_s9 = inlined_call_operand.vmem [shape: f32[1,128], index: 9, kind: input, shape index: {}]   ;;  %s1051_s10 = inlined_call_operand.vmem [shape: f32[1,128], index: 10, kind: input, shape index: {}]   ;;  %s1052_s11 = inlined_call_operand.<no memory space> [shape: f32[1,1], index: 11, kind: input, shape index: {}]   ;;  %s1053_s12 = inlined_call_operand.hbm [shape: f32[1,1], index: 12, kind: output, shape index: {}]  }
   0x1   :  { %19 = vsyncpa [#allocation5], 0  ;;  %s880_s21 = smov [#allocation3]   ;;  %s844_s25 = scalar_lea.hbm %s1049_s8, 2048 }
   0x2   :  { %s41_s22 = sshll.u32 %s880_s21, 4  ;;  %p845_p0 = scmp.ne.s32.totalorder %s1049_s8, %s844_s25  ;;  %s42_s22 = int_to_ptr.vmem [resolvable:$true] %s41_s22 }
   0x3   :  { %p848_p1 = scmp.lt.u32.totalorder %s844_s25, %s1049_s8 }
   0x5   :  { %p850_p2 = pnand %p848_p1, %p845_p0 }
   0x7   :  { %853 = shalt.err (!%p850_p2)
}
   0x8   :  { %s854_s30 = scalar_lea.vmem %s42_s22, 2048  ;;  %p859_p4 = scmp.lt.s32.totalorder %s42_s22, %s42_s22 }
   0x9   :  { %p855_p3 = scmp.ne.s32.totalorder %s42_s22, %s854_s30  ;;  %p860_p5 = scmp.lt.s32.totalorder %s854_s30, %s854_s30 }
   0xb   :  { %p861_p6 = por %p860_p5, %p859_p4 }
   0xd   :  { %p862_p7 = pnand %p861_p6, %p855_p3 }
   0xf   :  { %865 = shalt.err (!%p862_p7)
}
  0x10   :  { %s881_s13 = smov 128   ;;  %s882_s14 = smov 8  }
  0x11   :  { %47 = dma.hbm_to_vmem [thread:$0]  %s1049_s8, 2048, %s42_s22, [#allocation4], %s881_s13, %s881_s13, %s882_s14  }
  0x12   :  { %876 = dma.done.wait [#allocation4], 2048  }
  0x13   :  { %877 = vsyncadd [#allocation4], 4294965248  ;;  %v883_v0 = vmov 0.0   ;;  %vm884_vm0 = vmmov 0   ;;  %vm72_vm1 = vcmask 1043456   ;;  %v57_v2 = vld [vmem:[%s1044_s3] sm:$0xff] }
  0x14   :  { %684 = vmatprep.subr.mxu1 %v883_v0  ;;  %686 = vmatprep.mubr.msk.f32.mxu1 %vm884_vm0, %v883_v0  ;;  %v67_v1 = vld [vmem:[%s1047_s6] sm:$0xf]  ;;  %v58_v4 = vmul.f32 2.0, %v57_v2  ;;  %v66_v5 = vld [vmem:[%s1046_s5 + $0x8] sm:$0xff]  ;;  %v885_v7 = vmov 0.0|0.0   ;;  %vm68_vm2 = vcmask 31744  }
  0x15   :  { %696 = vmatprep.subr.mxu0 %v883_v0  ;;  %698 = vmatprep.mubr.msk.f32.mxu0 %vm884_vm0, %v883_v0  ;;  %v65_v3 = vld [vmem:[%s1046_s5] sm:$0xff]  ;;  %v309_v14 = vld [vmem:[#allocation3 + $0x8] sm:$0xff]  ;;  %vm146_vm3 = vcmask 130048   ;;  %v310_v18 = vld [vmem:[#allocation3 + $0x10] sm:$0xff]  ;;  %vm603_vm6 = vcmask 7168   ;;  %s866_s14 = scalar_lea.hbm %s1053_s12, 16 }
  0x16   :  { %685 = vmatpush3.msk.msra.mxu1 %vm72_vm1, %v67_v1  ;;  %v229_v6 = vld [vmem:[%s1045_s4] sm:$0xf]  ;;  %v777_v8 = vpack.c.bf16 %v66_v5, %v65_v3  ;;  %v630_v11 = vadd.f32 -1.0, %v58_v4  ;;  %v311_v19 = vld [vmem:[#allocation3 + $0x18] sm:$0xff]  ;;  %v313_v22 = vld [vmem:[#allocation3 + $0x28] sm:$0xff]  ;;  %p867_p8 = scmp.ne.s32.totalorder %s1053_s12, %s866_s14  ;;  %p870_p9 = scmp.lt.u32.totalorder %s866_s14, %s1053_s12 }
  0x17   :  { %776 = vmatprep.subr.bf16.mxu1 %v885_v7  ;;  %697 = vmatpush3.msk.msra.mxu0 %vm72_vm1, %v229_v6  ;;  %v60_v9 = vld [vmem:[%s1041_s0] sm:$0xff]  ;;  %v783_v20 = vpack.c.bf16 %v311_v19, %v310_v18  ;;  %v314_v24 = vld [vmem:[#allocation3 + $0x30] sm:$0xff]  ;;  %v315_v25 = vld [vmem:[#allocation3 + $0x38] sm:$0xff] }
  0x18   :  { %v62_v10 = vld [vmem:[%s1042_s1] sm:$0xff]  ;;  %v61_v12 = vmul.f32 %v60_v9, %v57_v2  ;;  %736 = vmatprep.subr.mxu0 %v883_v0  ;;  %687 = vmatmul.mubr.msk.f32.vlgmr.msra.gmra.mrb[0].mxu1 %vm68_vm2, %v630_v11  ;;  %v789_v26 = vpack.c.bf16 %v315_v25, %v314_v24  ;;  %v317_v28 = vld [vmem:[#allocation3 + $0x48] sm:$0xff]  ;;  %v318_v30 = vld [vmem:[#allocation3 + $0x50] sm:$0xff]  ;;  %p872_p10 = pnand %p870_p9, %p867_p8 }
  0x19   :  { %v308_v13 = vld [vmem:[#allocation3] sm:$0xff]  ;;  %v63_v15 = vmul.f32 %v62_v10, %v57_v2  ;;  %778 = vmatpush3.bf16.msra.mxu1 %v777_v8  ;;  %693 = vmatprep.mubr.msk.f32.mxu1 %vm884_vm0, %v883_v0  ;;  %v319_v31 = vld [vmem:[#allocation3 + $0x58] sm:$0xff]  ;;  %v321_v34 = vld [vmem:[#allocation3 + $0x68] sm:$0xff]  ;;  %v412_v2 = vstv %s1052_s11 }
  0x1a   :  { %699 = vmatmul.mubr.msk.f32.vlgmr.msra.gmra.mrb[0].mxu0 %vm68_vm2, %v61_v12  ;;  %v64_v16 = vld [vmem:[%s1043_s2] sm:$0xff]  ;;  %v780_v17 = vpack.c.bf16 %v309_v14, %v308_v13  ;;  %779 = vmatprep.subr.bf16.mxu1 %v885_v7  ;;  %v795_v32 = vpack.c.bf16 %v319_v31, %v318_v30  ;;  %v322_v36 = vld [vmem:[#allocation3 + $0x70] sm:$0xff]  ;;  %v323_v37 = vld [vmem:[#allocation3 + $0x78] sm:$0xff] }
  0x1b   :  { %737 = vmatpush3.msk.msra.mxu0 %vm72_vm1, %v229_v6  ;;  %738 = vmatprep.mubr.msk.f32.mxu0 %vm884_vm0, %v883_v0  ;;  %v312_v21 = vld [vmem:[#allocation3 + $0x20] sm:$0xff]  ;;  %v801_v38 = vpack.c.bf16 %v323_v37, %v322_v36 }
  0x1c   :  { %803 = vmatprep.subr.bf16.mxu0 %v885_v7  ;;  %694 = vmatmul.mubr.msk.f32.vlgmr.msra.gmra.mrb[2].mxu1 %vm146_vm3, %v64_v16  ;;  %v786_v23 = vpack.c.bf16 %v313_v22, %v312_v21  ;;  %v316_v27 = vld [vmem:[#allocation3 + $0x40] sm:$0xff] }
  0x1d   :  { %781 = vmatpush3.bf16.msra.mxu1 %v780_v17  ;;  %733 = vmatprep.mubr.msk.f32.mxu1 %vm884_vm0, %v883_v0  ;;  %v792_v29 = vpack.c.bf16 %v317_v28, %v316_v27  ;;  %v320_v33 = vld [vmem:[#allocation3 + $0x60] sm:$0xff] }
  0x1e   :  { %739 = vmatmul.mubr.msk.f32.vlgmr.msra.gmra.mrb[2].mxu0 %vm68_vm2, %v63_v15  ;;  %782 = vmatprep.subr.bf16.mxu1 %v885_v7  ;;  %v798_v35 = vpack.c.bf16 %v321_v34, %v320_v33  ;;  %v634_v44 = vld [vmem:[%s1048_s7] ss:$0 sm:$0xff] }
  0x1f   :  { %805 = vmatpush3.bf16.msra.mxu0 %v780_v17  ;;  %773 = vmatprep.mubr.msk.f32.mxu0 %vm884_vm0, %v883_v0  ;;  %v637_v54 = vld [vmem:[%s1050_s9] ss:$0 sm:$0xff] }
  0x20   :  { %806 = vmatprep.subr.bf16.mxu0 %v885_v7  ;;  %v638_v61 = vld [vmem:[%s1051_s10] ss:$0 sm:$0xff] }
  0x21   :  { %784 = vmatpush3.bf16.msra.mxu1 %v783_v20 }
  0x22   :  { %785 = vmatprep.subr.bf16.mxu1 %v885_v7 }
  0x23   :  { %808 = vmatpush3.bf16.msra.mxu0 %v783_v20 }
  0x24   :  { %809 = vmatprep.subr.bf16.mxu0 %v885_v7 }
  0x25   :  { %787 = vmatpush3.bf16.msra.mxu1 %v786_v23 }
  0x26   :  { %788 = vmatprep.subr.bf16.mxu1 %v885_v7 }
  0x27   :  { %811 = vmatpush3.bf16.msra.mxu0 %v786_v23 }
  0x28   :  { %812 = vmatprep.subr.bf16.mxu0 %v885_v7 }
  0x29   :  { %790 = vmatpush3.bf16.msra.mxu1 %v789_v26 }
  0x2a   :  { %791 = vmatprep.subr.bf16.mxu1 %v885_v7 }
  0x2b   :  { %814 = vmatpush3.bf16.msra.mxu0 %v789_v26 }
  0x2c   :  { %815 = vmatprep.subr.bf16.mxu0 %v885_v7 }
  0x2d   :  { %793 = vmatpush3.bf16.msra.mxu1 %v792_v29 }
  0x2e   :  { %794 = vmatprep.subr.bf16.mxu1 %v885_v7 }
  0x2f   :  { %817 = vmatpush3.bf16.msra.mxu0 %v792_v29 }
  0x30   :  { %818 = vmatprep.subr.bf16.mxu0 %v885_v7 }
  0x31   :  { %796 = vmatpush3.bf16.msra.mxu1 %v795_v32 }
  0x32   :  { %797 = vmatprep.subr.bf16.mxu1 %v885_v7 }
  0x33   :  { %820 = vmatpush3.bf16.msra.mxu0 %v795_v32 }
  0x34   :  { %821 = vmatprep.subr.bf16.mxu0 %v885_v7 }
  0x35   :  { %799 = vmatpush3.bf16.msra.mxu1 %v798_v35 }
  0x36   :  { %800 = vmatprep.subr.bf16.mxu1 %v885_v7 }
  0x37   :  { %823 = vmatpush3.bf16.msra.mxu0 %v798_v35 }
  0x38   :  { %824 = vmatprep.subr.bf16.mxu0 %v885_v7 }
  0x39   :  { %802 = vmatpush3.bf16.msra.mxu1 %v801_v38 }
  0x3b   :  { %826 = vmatpush3.bf16.msra.mxu0 %v801_v38 }
  0xeb   :  { %v142_v39 = vpop.f32.mrb[0].mxu1 }
  0xec   :  { %v688_v41 = vpop.f32.mrb[1].mxu1 }
  0xed   :  { %v302_v40 = vpop.f32.mrb[0].mxu0 }
  0xee   :  { %v700_v42 = vpop.f32.mrb[1].mxu0 }
  0xef   :  { %v216_v43 = vpop.f32.mrb[2].mxu1 }
  0xf0   :  { %v217_v46 = vadd.f32 %v216_v43, %v142_v39  ;;  %v695_v47 = vpop.f32.mrb[3].mxu1 }
  0xf1   :  { %v483_v45 = vpop.f32.mrb[2].mxu0 }
  0xf2   :  { %v740_v48 = vpop.f32.mrb[3].mxu0  ;;  %v227_v49 = vadd.f32 %v634_v44, %v217_v46 }
  0xf4   :  { %v306_v50 = vadd.f32 %v302_v40, %v227_v49  ;;  %v487_v51 = vadd.f32 %v483_v45, %v227_v49 }
  0xf6   :  { %v307_v52 = vmax.f32 %v306_v50, 0.0  ;;  %v488_v53 = vmax.f32 %v487_v51, 0.0 }
  0xf8   :  { %734 = vmatmul.mubr.f32.vlgmr.msra.gmra.mrb[4].mxu1 %v307_v52  ;;  %774 = vmatmul.mubr.f32.vlgmr.msra.gmra.mrb[4].mxu0 %v488_v53 }
 0x1cb   :  { %v397_v55 = vpop.f32.mrb[4].mxu1  ;;  %v555_v56 = vpop.f32.mrb[4].mxu0 }
 0x1cc   :  { %v398_v57 = vadd.f32 %v637_v54, %v397_v55  ;;  %v556_v58 = vadd.f32 %v637_v54, %v555_v56  ;;  %v735_v59 = vpop.f32.mrb[5].mxu1  ;;  %v775_v60 = vpop.f32.mrb[5].mxu0 }
 0x1ce   :  { %v401_v62 = vmax.f32 %v398_v57, 0.0  ;;  %v559_v63 = vmax.f32 %v556_v58, 0.0 }
 0x1d0   :  { %v409_v0 = vmul.f32 %v638_v61, %v401_v62  ;;  %v560_v1 = vmul.f32 %v638_v61, %v559_v63 }
 0x1d2   :  { %410 = vadd.xlane.f32.xlu0 %v409_v0 }
 0x1d6   :  { %561 = vadd.xlane.f32.xlu0 %v560_v1 }
 0x25f   :  { %v411_v3 = vpop.xlane.xlu0 %410 }
 0x260   :  { %v413_v4 = vadd.f32 %v412_v2, %v411_v3 }
 0x262   :  { %v564_v5 = vsub.f32 0.0, %v413_v4 }
 0x263   :  { %v562_v6 = vpop.xlane.xlu0 %561 }
 0x264   :  { %v566_v7 = vand.u32 2147483647, %v564_v5  ;;  %v563_v8 = vadd.f32 %v562_v6, %v412_v2  ;;  %v565_v31 = vmax.f32 %v564_v5, 0.0 }
 0x266   :  { %v567_v9 = vsub.f32 0.0, %v566_v7  ;;  %v581_v10 = vand.u32 2147483647, %v563_v8  ;;  %v580_v32 = vmax.f32 %v563_v8, 0.0 }
 0x268   :  { %v568_v11 = vmul.f32 1.442695, %v567_v9  ;;  %v582_v12 = vsub.f32 0.0, %v581_v10 }
 0x26a   :  { %836 = vpow2.f32 %v568_v11  ;;  %v583_v13 = vmul.f32 1.442695, %v582_v12 }
 0x26c   :  { %838 = vpow2.f32 %v583_v13 }
 0x274   :  { %v837_v14 = vpop.eup %836 }
 0x275   :  { %v570_v15 = vadd.f32 1.0, %v837_v14  ;;  %v573_v18 = vmul.f32 -0.5, %v837_v14  ;;  %v576_v21 = vand.u32 2147483647, %v837_v14 }
 0x276   :  { %v839_v16 = vpop.eup %838 }
 0x277   :  { %840 = vlog2.f32 %v570_v15  ;;  %v585_v17 = vadd.f32 1.0, %v839_v16  ;;  %v588_v19 = vmul.f32 -0.5, %v839_v16  ;;  %v574_v20 = vadd.f32 1.0, %v573_v18 }
 0x278   :  { %v591_v24 = vand.u32 2147483647, %v839_v16  ;;  %vm577_vm4 = vcmp.lt.f32.partialorder %v576_v21, 0.0004427343 }
 0x279   :  { %842 = vlog2.f32 %v585_v17  ;;  %v589_v22 = vadd.f32 1.0, %v588_v19  ;;  %v575_v26 = vmul.f32 %v837_v14, %v574_v20 }
 0x27a   :  { %vm592_vm5 = vcmp.lt.f32.partialorder %v591_v24, 0.0004427343 }
 0x27b   :  { %v590_v30 = vmul.f32 %v839_v16, %v589_v22 }
 0x281   :  { %v841_v23 = vpop.eup %840 }
 0x282   :  { %v572_v25 = vmul.f32 0.6931472, %v841_v23 }
 0x283   :  { %v843_v27 = vpop.eup %842 }
 0x284   :  { %v578_v28 = vsel %vm577_vm4, %v575_v26, %v572_v25  ;;  %v587_v29 = vmul.f32 0.6931472, %v843_v27 }
 0x285   :  { %v579_v34 = vadd.f32 %v578_v28, %v565_v31 }
 0x286   :  { %v593_v33 = vsel %vm592_vm5, %v590_v30, %v587_v29 }
 0x287   :  { %v594_v35 = vadd.f32 %v593_v33, %v580_v32 }
 0x289   :  { %v595_v36 = vadd.f32 %v594_v35, %v579_v34 }
 0x28b   :  { %v604_v37 = vsel %vm603_vm6, %v595_v36, 0.0 }
 0x28c   :  { %605 = vadd.xlane.f32.xlu1 %v604_v37 }
 0x319   :  { %v606_v38 = vpop.xlane.xlu1 %605 }
 0x31a   :  { %v607_v39 = vrot.slane %v606_v38, 4 }
 0x31c   :  { %v608_v40 = vadd.f32 %v607_v39, %v606_v38 }
 0x31e   :  { %v609_v41 = vrot.slane %v608_v40, 2 }
 0x320   :  { %v610_v42 = vadd.f32 %v609_v41, %v608_v40 }
 0x322   :  { %v611_v43 = vrot.slane %v610_v42, 1 }
 0x324   :  { %v612_v44 = vadd.f32 %v611_v43, %v610_v42 }
 0x326   :  { %827 = vpush %v612_v44 }
 0x357   :  { %s828_s9 = spop %827 }
 0x358   :  { %615 = sst [smem:[#allocation6]] %s828_s9 }
 0x359   :  { %875 = shalt.err (!%p872_p10)
}
 0x35a   :  { %s886_s19 = smov [#allocation6]  }
 0x35b   :  { %623 = dma.smem_to_hbm %s886_s19, 16, %s1053_s12, [#allocation5]  }
 0x35c   :  { %878 = dma.done.wait [#allocation5], 16  }
 0x35d   :  { %879 = vsyncadd [#allocation5], 4294967280 }
 0x35e   :  { %627 = sfence }
 0x35f   :  { %628 = vsyncpa [#allocation4], 1 }
 0x360   :  { %629 = vsyncpa [#allocation5], 1 }

</bundles_post_ra>
